<compile_context>
chip_gen: v7x
topology: tpu7x:2x2x1
jax: 0.10.0
libtpu: 0.0.40
codegen_flags: <defaults>
</compile_context>

<pallas_src>
import jax
import jax.numpy as jnp
from jax.experimental import pallas as pl
from jax.experimental.pallas import tpu as pltpu

EPS = 1e-5
LANE = 128


# ------------------------------- kernels -----------------------------------
def matmul_stats_kernel(p_ref, w_ref, o_ref, st_ref):
    """(TM, K)bf16 @ (K, Cpad)bf16 -> f32 tile + per-tile channel sum/sum^2."""
    acc = jnp.dot(p_ref[...], w_ref[...], preferred_element_type=jnp.float32)
    o_ref[...] = acc
    s = jnp.sum(acc, axis=0, keepdims=True)           # (1, Cpad)
    ss = jnp.sum(acc * acc, axis=0, keepdims=True)     # (1, Cpad)
    pad = jnp.zeros((6, acc.shape[1]), jnp.float32)    # sublane-pad to 8 rows
    st_ref[...] = jnp.concatenate([s, ss, pad], axis=0)


def bn_act_kernel(x_ref, s_ref, t_ref, o_ref):
    """y = relu(x * scale + shift)  (bn1 + relu)."""
    y = x_ref[...] * s_ref[...] + t_ref[...]
    o_ref[...] = jnp.maximum(y, 0.0).astype(o_ref.dtype)


def bn_add_relu_kernel(x_ref, r_ref, s_ref, t_ref, o_ref):
    """y = relu(x * scale + shift + residual)  (bn2 + identity shortcut)."""
    y = x_ref[...] * s_ref[...] + t_ref[...] + r_ref[...]
    o_ref[...] = jnp.maximum(y, 0.0).astype(o_ref.dtype)


def bn2_bnsc_add_relu_kernel(x_ref, r_ref, s2_ref, t2_ref, ss_ref, ts_ref, o_ref):
    """y = relu(bn2(conv2) + bn_sc(shortcut_conv))  (projection shortcut)."""
    y = (x_ref[...] * s2_ref[...] + t2_ref[...]
         + r_ref[...] * ss_ref[...] + ts_ref[...])
    o_ref[...] = jnp.maximum(y, 0.0).astype(o_ref.dtype)


# ----------------------------- pallas_call glue -----------------------------
def _cparams():
    return pltpu.CompilerParams(
        dimension_semantics=("parallel",),
        vmem_limit_bytes=48 * 1024 * 1024,   # safe on v7x's 64 MiB VMEM
    )


def _matmul_stats(p, w, tm):
    """p: (Mp, K) bf16, w: (K, Cpad) bf16 -> (Mp, Cpad) f32, (nt*8, Cpad) f32."""
    mp, k = p.shape
    cpad = w.shape[1]
    nt = mp // tm
    return pl.pallas_call(
        matmul_stats_kernel,
        out_shape=(jax.ShapeDtypeStruct((mp, cpad), jnp.float32),
                   jax.ShapeDtypeStruct((nt * 8, cpad), jnp.float32)),
        grid=(nt,),
        in_specs=[pl.BlockSpec((tm, k), lambda i: (i, 0)),
                  pl.BlockSpec((k, cpad), lambda i: (0, 0))],
        out_specs=(pl.BlockSpec((tm, cpad), lambda i: (i, 0)),
                   pl.BlockSpec((8, cpad), lambda i: (i, 0))),
        compiler_params=_cparams(),
    )(p, w)


def _bn_act(x, scale, shift, tm, out_dtype=jnp.float32):
    mp, cpad = x.shape
    nt = mp // tm
    return pl.pallas_call(
        bn_act_kernel,
        out_shape=jax.ShapeDtypeStruct((mp, cpad), out_dtype),
        grid=(nt,),
        in_specs=[pl.BlockSpec((tm, cpad), lambda i: (i, 0)),
                  pl.BlockSpec((1, cpad), lambda i: (0, 0)),
                  pl.BlockSpec((1, cpad), lambda i: (0, 0))],
        out_specs=pl.BlockSpec((tm, cpad), lambda i: (i, 0)),
        compiler_params=_cparams(),
    )(x, scale, shift)


def _bn2_ident(x, res, scale, shift, tm):
    mp, cpad = x.shape
    nt = mp // tm
    return pl.pallas_call(
        bn_add_relu_kernel,
        out_shape=jax.ShapeDtypeStruct((mp, cpad), jnp.float32),
        grid=(nt,),
        in_specs=[pl.BlockSpec((tm, cpad), lambda i: (i, 0)),
                  pl.BlockSpec((tm, cpad), lambda i: (i, 0)),
                  pl.BlockSpec((1, cpad), lambda i: (0, 0)),
                  pl.BlockSpec((1, cpad), lambda i: (0, 0))],
        out_specs=pl.BlockSpec((tm, cpad), lambda i: (i, 0)),
        compiler_params=_cparams(),
    )(x, res, scale, shift)


def _bn2_proj(x, sc_raw, s2, t2, ssc, tsc, tm):
    mp, cpad = x.shape
    nt = mp // tm
    return pl.pallas_call(
        bn2_bnsc_add_relu_kernel,
        out_shape=jax.ShapeDtypeStruct((mp, cpad), jnp.float32),
        grid=(nt,),
        in_specs=[pl.BlockSpec((tm, cpad), lambda i: (i, 0)),
                  pl.BlockSpec((tm, cpad), lambda i: (i, 0)),
                  pl.BlockSpec((1, cpad), lambda i: (0, 0)),
                  pl.BlockSpec((1, cpad), lambda i: (0, 0)),
                  pl.BlockSpec((1, cpad), lambda i: (0, 0)),
                  pl.BlockSpec((1, cpad), lambda i: (0, 0))],
        out_specs=pl.BlockSpec((tm, cpad), lambda i: (i, 0)),
        compiler_params=_cparams(),
    )(x, sc_raw, s2, t2, ssc, tsc)


# ------------------------------ host-side glue -------------------------------
def _round_up(x, m):
    return (x + m - 1) // m * m


def _pad_rows(a, rows):
    return jnp.pad(a, ((0, rows - a.shape[0]), (0, 0)))


def _pad_cols(a, cols):
    return jnp.pad(a, ((0, 0), (0, cols - a.shape[1])))


def _pad_vec(v, cpad):
    return jnp.pad(v.astype(jnp.float32), (0, cpad - v.shape[0]))


def _im2col3x3(x_nhwc, stride):
    """padding=1, 3x3: taps concatenated along channels -> (M, 9*C) bf16."""
    n, h, w, c = x_nhwc.shape
    xp = jnp.pad(x_nhwc, ((0, 0), (1, 1), (1, 1), (0, 0)))
    ho = (h + 2 - 3) // stride + 1
    wo = (w + 2 - 3) // stride + 1
    pats = []
    for kh in range(3):
        for kw in range(3):
            p = xp[:, kh:kh + (ho - 1) * stride + 1:stride,
                     kw:kw + (wo - 1) * stride + 1:stride, :]
            pats.append(p.reshape(n * ho * wo, c))
    return jnp.concatenate(pats, axis=1).astype(jnp.bfloat16)


def _prep_w3x3(w_oihw, cpad):
    """PyTorch (O, I, 3, 3) -> (9*I, Cpad) bf16, row order matches im2col."""
    o, i = w_oihw.shape[0], w_oihw.shape[1]
    wt = jnp.transpose(w_oihw, (2, 3, 1, 0)).reshape(9 * i, o)
    return _pad_cols(wt, cpad).astype(jnp.bfloat16)


def _finalize_stats(stats, m_real, gamma_p, beta_p):
    """Reduce per-tile partial sums -> per-channel BN scale/shift (f32)."""
    cpad = stats.shape[-1]
    st = stats.reshape(-1, 8, cpad)
    s = jnp.sum(st[:, 0, :], axis=0)
    ss = jnp.sum(st[:, 1, :], axis=0)
    mean = s / m_real
    var = ss / m_real - mean * mean
    scale = gamma_p * jax.lax.rsqrt(var + EPS)
    shift = beta_p - mean * scale
    return scale.reshape(1, cpad), shift.reshape(1, cpad)


def basic_block_forward(x_nchw, params, stride=1, tm=256):
    """PyTorch-equivalent BasicBlock forward. Input/output are NCHW float32."""
    w1, g1, b1 = params["w1"], params["g1"], params["b1"]
    w2, g2, b2 = params["w2"], params["g2"], params["b2"]
    in_planes = x_nchw.shape[1]
    planes = w1.shape[0]
    cpad = _round_up(planes, LANE)

    x = jnp.transpose(x_nchw, (0, 2, 3, 1)).astype(jnp.float32)  # NHWC
    n, h, w, _ = x.shape
    ho = (h + 2 - 3) // stride + 1
    wo = (w + 2 - 3) // stride + 1
    m = n * ho * wo
    mp = _round_up(m, tm)

    # ---- conv1 (+ batch stats) -> bn1 + relu ----
    p1 = _pad_rows(_im2col3x3(x, stride), mp)                 # (Mp, 9*Cin) bf16
    out1, st1 = _matmul_stats(p1, _prep_w3x3(w1, cpad), tm)
    sc1, sh1 = _finalize_stats(st1, m, _pad_vec(g1, cpad), _pad_vec(b1, cpad))
    y1 = _bn_act(out1, sc1, sh1, tm, out_dtype=jnp.bfloat16)  # (Mp, Cpad) bf16

    # ---- conv2 (+ batch stats) ----
    y1_nhwc = y1[:m, :planes].reshape(n, ho, wo, planes)
    p2 = _pad_rows(_im2col3x3(y1_nhwc, 1), mp)                # (Mp, 9*planes) bf16
    out2, st2 = _matmul_stats(p2, _prep_w3x3(w2, cpad), tm)
    sc2, sh2 = _finalize_stats(st2, m, _pad_vec(g2, cpad), _pad_vec(b2, cpad))

    # ---- shortcut + bn2 + add + relu ----
    if stride != 1 or in_planes != planes:
        wsc, gsc, bsc = params["wsc"], params["gsc"], params["bsc"]
        xs = x[:, ::stride, ::stride, :].reshape(m, in_planes).astype(jnp.bfloat16)
        xs = _pad_rows(xs, mp)                                 # (Mp, Cin) bf16
        wscf = _pad_cols(jnp.transpose(wsc[:, :, 0, 0], (1, 0)), cpad)
        wscf = wscf.astype(jnp.bfloat16)                       # (Cin, Cpad)
        sc_raw, stsc = _matmul_stats(xs, wscf, tm)
        scsc, shsc = _finalize_stats(stsc, m, _pad_vec(gsc, cpad),
                                     _pad_vec(bsc, cpad))
        out = _bn2_proj(out2, sc_raw, sc2, sh2, scsc, shsc, tm)
    else:
        xs = _pad_rows(_pad_cols(x.reshape(m, planes), cpad), mp)  # f32 residual
        out = _bn2_ident(out2, xs, sc2, sh2, tm)

    out = out[:m, :planes].reshape(n, ho, wo, planes)
    return jnp.transpose(out, (0, 3, 1, 2))  # back to NCHW


# ------------------------------ pure-JAX reference --------------------------
def _reference(x, params, stride):
    def conv(x_, w_, s, pad):
        return jax.lax.conv_general_dilated(
            x_, w_, (s, s), [(pad, pad), (pad, pad)],
            dimension_numbers=("NCHW", "OIHW", "NCHW"))

    def bn(x_, g, b):
        mean = jnp.mean(x_, axis=(0, 2, 3), keepdims=True)
        var = jnp.mean((x_ - mean) ** 2, axis=(0, 2, 3), keepdims=True)
        return ((x_ - mean) * jax.lax.rsqrt(var + EPS)
                * g.reshape(1, -1, 1, 1) + b.reshape(1, -1, 1, 1))

    out = jax.nn.relu(bn(conv(x, params["w1"], stride, 1), params["g1"], params["b1"]))
    out = bn(conv(out, params["w2"], 1, 1), params["g2"], params["b2"])
    in_planes, planes = x.shape[1], params["w1"].shape[0]
    if stride != 1 or in_planes != planes:
        sc = bn(conv(x, params["wsc"], stride, 0), params["gsc"], params["bsc"])
    else:
        sc = x
    return jax.nn.relu(out + sc)


# ---------------------------------- main ------------------------------------
if __name__ == "__main__":
    key = jax.random.PRNGKey(0)
    n, cin, h, w_sp = 2, 4, 16, 16
    planes, stride = 8, 1  # in_planes != planes -> projection shortcut
    ks = jax.random.split(key, 4)

    x = jax.random.normal(ks[0], (n, cin, h, w_sp), jnp.float32)
    params = dict(
        w1=jax.random.normal(ks[1], (planes, cin, 3, 3), jnp.float32) * 0.1,
        g1=jnp.ones((planes,), jnp.float32), b1=jnp.zeros((planes,), jnp.float32),
        w2=jax.random.normal(ks[2], (planes, planes, 3, 3), jnp.float32) * 0.1,
        g2=jnp.ones((planes,), jnp.float32), b2=jnp.zeros((planes,), jnp.float32),
        wsc=jax.random.normal(ks[3], (planes, cin, 1, 1), jnp.float32) * 0.1,
        gsc=jnp.ones((planes,), jnp.float32), bsc=jnp.zeros((planes,), jnp.float32),
    )

    out = jax.block_until_ready(basic_block_forward(x, params, stride))
    ref = jax.block_until_ready(_reference(x, params, stride))

    assert out.shape == (n, planes, h, w_sp), out.shape
    rel = float(jnp.max(jnp.abs(out - ref)) / (jnp.max(jnp.abs(ref)) + 1e-6))
    assert rel < 2e-2, f"relative max error too large: {rel}"

    # also exercise the identity-shortcut variant (in_planes == planes, stride 1)
    params_id = dict(
        w1=jax.random.normal(ks[1], (cin, cin, 3, 3), jnp.float32) * 0.1,
        g1=jnp.ones((cin,), jnp.float32), b1=jnp.zeros((cin,), jnp.float32),
        w2=jax.random.normal(ks[2], (cin, cin, 3, 3), jnp.float32) * 0.1,
        g2=jnp.ones((cin,), jnp.float32), b2=jnp.zeros((cin,), jnp.float32),
    )
    out_id = jax.block_until_ready(basic_block_forward(x, params_id, 1))
    ref_id = jax.block_until_ready(_reference(x, params_id, 1))
    rel_id = float(jnp.max(jnp.abs(out_id - ref_id)) / (jnp.max(jnp.abs(ref_id)) + 1e-6))
    assert rel_id < 2e-2, f"relative max error too large (identity): {rel_id}"

    print("KERNEL_OK")
</pallas_src>

<mosaic_0001>
module attributes {stable_mosaic.version = 11 : i64} {
  func.func @matmul_stats_kernel(%arg0: i32, %arg1: memref<256x36xbf16, #tpu.memory_space<vmem>>, %arg2: memref<36x128xbf16, #tpu.memory_space<vmem>>, %arg3: memref<256x128xf32, #tpu.memory_space<vmem>>, %arg4: memref<8x128xf32, #tpu.memory_space<vmem>>) attributes {dimension_semantics = [#tpu.dimension_semantics<parallel>], iteration_bounds = array<i64: 2>, scalar_prefetch = 0 : i64, scratch_operands = 0 : i64, tpu.core_type = #tpu.core_type<tc>, window_params = [{transform_indices = @transform_0, window_bounds = array<i64: 256, 36>}, {pipeline_mode = #tpu.pipeline_mode<synchronous>, transform_indices = @transform_1, window_bounds = array<i64: 36, 128>}, {transform_indices = @transform_2, window_bounds = array<i64: 256, 128>}, {transform_indices = @transform_3, window_bounds = array<i64: 8, 128>}]} {
    %c0 = arith.constant 0 : index
    %c0_0 = arith.constant 0 : index
    %0 = vector.load %arg1[%c0, %c0_0] : memref<256x36xbf16, #tpu.memory_space<vmem>>, vector<256x36xbf16>
    %c0_1 = arith.constant 0 : index
    %c0_2 = arith.constant 0 : index
    %1 = vector.load %arg2[%c0_1, %c0_2] : memref<36x128xbf16, #tpu.memory_space<vmem>>, vector<36x128xbf16>
    %cst = arith.constant dense<0.000000e+00> : vector<256x128xf32>
    %2 = tpu.matmul %0, %1, %cst {dimension_numbers = #tpu.dot_dimension_numbers<[1], [0], [0], [1], [0, 0, 1, 1], [], []>} : vector<256x36xbf16>, vector<36x128xbf16>, vector<256x128xf32> -> vector<256x128xf32>
    %c0_3 = arith.constant 0 : index
    %c0_4 = arith.constant 0 : index
    %3 = vector.load %arg3[%c0_3, %c0_4] : memref<256x128xf32, #tpu.memory_space<vmem>>, vector<256x128xf32>
    tpu.vector_store %arg3[%c0_3, %c0_4], %2 {strides = array<i32>} : memref<256x128xf32, #tpu.memory_space<vmem>>, vector<256x128xf32>,
    %cst_5 = arith.constant dense<0.000000e+00> : vector<128xf32>
    %4 = vector.multi_reduction <add>, %2, %cst_5 [0] : vector<256x128xf32> to vector<128xf32>
    %5 = vector.shape_cast %4 : vector<128xf32> to vector<1x128xf32>
    %6 = arith.mulf %2, %2 : vector<256x128xf32>
    %cst_6 = arith.constant dense<0.000000e+00> : vector<128xf32>
    %7 = vector.multi_reduction <add>, %6, %cst_6 [0] : vector<256x128xf32> to vector<128xf32>
    %8 = vector.shape_cast %7 : vector<128xf32> to vector<1x128xf32>
    %cst_7 = arith.constant 0.000000e+00 : f32
    %9 = vector.broadcast %cst_7 : f32 to vector<6x128xf32>
    %10 = tpu.concatenate %5, %8, %9 in 0 : vector<1x128xf32>, vector<1x128xf32>, vector<6x128xf32> -> vector<8x128xf32>
    %c0_8 = arith.constant 0 : index
    %c0_9 = arith.constant 0 : index
    %11 = vector.load %arg4[%c0_8, %c0_9] : memref<8x128xf32, #tpu.memory_space<vmem>>, vector<8x128xf32>
    tpu.vector_store %arg4[%c0_8, %c0_9], %10 {strides = array<i32>} : memref<8x128xf32, #tpu.memory_space<vmem>>, vector<8x128xf32>,
    return
  }
  func.func @transform_0(%arg0: i32) -> (i32, i32) {
    %c0_i32 = arith.constant 0 : i32
    %c0_i32_0 = arith.constant 0 : i32
    return %arg0, %c0_i32 : i32, i32
  }
  func.func @transform_1(%arg0: i32) -> (i32, i32) {
    %c0_i32 = arith.constant 0 : i32
    %c0_i32_0 = arith.constant 0 : i32
    %c0_i32_1 = arith.constant 0 : i32
    return %c0_i32, %c0_i32_0 : i32, i32
  }
  func.func @transform_2(%arg0: i32) -> (i32, i32) {
    %c0_i32 = arith.constant 0 : i32
    %c0_i32_0 = arith.constant 0 : i32
    return %arg0, %c0_i32 : i32, i32
  }
  func.func @transform_3(%arg0: i32) -> (i32, i32) {
    %c0_i32 = arith.constant 0 : i32
    %c0_i32_0 = arith.constant 0 : i32
    return %arg0, %c0_i32 : i32, i32
  }
}

</mosaic_0001>

<bundles_post_ra>
// kernel: tpu_custom_call.1
= control target key start
LH: loop header
LB: loop body
LE: loop exit
PB: predicated region body
PF: predicated region fallthrough
CT: control target
= control target key end

     0   :  { %9 = vsyncpa [#allocation3], 0  ;;  %s1413_s0 = inlined_call_operand.vmem [shape: bf16[512,36], index: 0, kind: input, shape index: {}]   ;;  %s1414_s1 = inlined_call_operand.vmem [shape: bf16[36,128], index: 1, kind: input, shape index: {}]   ;;  %s1415_s2 = inlined_call_operand.hbm [shape: f32[512,128], index: 2, kind: output, shape index: {0}]   ;;  %s1416_s3 = inlined_call_operand.hbm [shape: f32[16,128], index: 3, kind: output, shape index: {1}]  }
   0x1   :  { %11 = vsyncpa [#allocation3 + $0x1], 0 }
   0x2   :  { %12 = vsyncpa [#allocation5], 0 }
   0x3   :  { %14 = vsyncpa [#allocation5 + $0x1], 0  ;;  %s1099_s12 = smov 0   ;;  %s1101_s13 = smov 0  }
   0x4   :  { %s1103_s14 = smov 0   ;;  %s1105_s15 = smov 0  }
   0x5 LB: > { %s1120_s16 = sadd.s32 4294967295, %s1073_s15   ;;  %s798_s17 = sadd.s32 4294967294, %s1073_s15   ;;  %s1073_s15 = sphi %s1105_s15, %s1422_s15   ;;  %s1069_s14 = sphi %s1103_s14, %s1421_s14   ;;  %s1065_s13 = sphi %s1101_s13, %s1420_s13   ;;  %s1061_s12 = sphi %s1099_s12, %s1419_s12  }
   0x6   : > { %s1124_s18 = sadd.s32 1, %s1073_s15   ;;  %s74_s19 = sadd.s32 1, %s1069_s14 }
   0x7   : > { %s71_s20 = ssub.s32 %s1073_s15, %s1124_s18  ;;  %p84_p0 = scmp.ne.s32.totalorder %s1069_s14, %s1065_s13 }
   0x8   : > { %p72_p1 = scmp.eq.s32.totalorder %s71_s20, 0  ;;  %p85_p2 = scmp.eq.s32.totalorder %s1120_s16, 1 }
   0x9   : > { %p90_p3 = scmp.ne.s32.totalorder %s1065_s13, %s1061_s12  ;;  %p91_p4 = scmp.eq.s32.totalorder %s798_s17, 1 }
   0xa   : > { %s1135_s21 = scalar_select %p72_p1, %s1069_s14, %s74_s19  }
   0xb   : > { %p1137_p5 = por %p85_p2, %p84_p0  ;;  %p1141_p6 = por %p91_p4, %p90_p3 }
   0xc   : > { %p801_p7 = scmp.ge.s32.totalorder %s1073_s15, 1  ;;  %p147_p8 = scmp.lt.s32.totalorder %s1073_s15, 3 }
   0xe   : > { %p148_p9 = pnand %p801_p7, %p147_p8 }
   0xf   : > { %v960_v0 = vld [vmem:[%s1414_s1] sm:$0xff] (!%p148_p9)   ;;  %v961_v1 = vld [vmem:[%s1414_s1 + $0x8] sm:$0xff] (!%p148_p9)   ;;  %s804_s28 = sshll.u32 (!%p148_p9), %s1120_s16, 5  ;;  %v962_v2 = vld [vmem:[%s1414_s1 + $0x10] ss:$0 sps:$4 sm:$0x33] (!%p148_p9)  }
  0x10   : > { %151 = sbr.rel (%p148_p9) target bundleno = 346 (0x15a), region = 28  ;;  %868 = vmatprep.subr.bf16.mxu0 (!%p148_p9), %v960_v0  ;;  %p177_p10 = scmp.lt.s32.totalorder (!%p148_p9), %s804_s28, 63  ;;  %906 = vmatprep.subr.bf16.mxu1 (!%p148_p9), %v960_v0  ;;  %vm365_vm0 = vcmask (!%p148_p9), 1041408   ;;  %vm316_vm1 = vcmask (!%p148_p9), 293888  }
  0x11   : > { %869 = vmatpush3.bf16.msra.mxu0 (!%p148_p9), %v960_v0  ;;  %909 = vmatpush3.bf16.msra.mxu1 (!%p148_p9), %v960_v0  ;;  %v367_v3 = vsel (!%p148_p9), %vm365_vm0, %v962_v2, 0  ;;  %s1198_s8 = sand.u32 (!%p148_p9), 1, %s1065_s13   ;;  %s848_s11 = sshll.u32 (!%p148_p9), %s1120_s16, 12 }
  0x12   : > { %870 = vmatprep.subr.bf16.mxu0 (!%p148_p9), %v961_v1  ;;  %907 = vmatprep.subr.bf16.mxu1 (!%p148_p9), %v961_v1  ;;  %s802_s9 = sshll.u32 (!%p148_p9), %s1198_s8, 8  ;;  %s1278_s24 = scalar_lea.hbm (!%p148_p9), %s1415_s2, %s848_s11 }
  0x13   : > { %s1201_s10 = scalar_lea.vmem (!%p148_p9), [#allocation2], %s802_s9  ;;  %s673_s25 = scalar_lea.sflag (!%p148_p9), [#allocation3], %s1198_s8 }
  0x14   : > { %s691_s17 = sshll.u32 (!%p148_p9), %s1201_s10, 4  ;;  %s1075_s27 = smov (!%p148_p9), [#allocation2]   ;;  %s1280_s17 = int_to_ptr.vmem [resolvable:$true] %s691_s17 }
  0x15   : > { %871 = vmatpush3.bf16.msra.mxu0 (!%p148_p9), %v961_v1  ;;  %910 = vmatpush3.bf16.msra.mxu1 (!%p148_p9), %v961_v1  ;;  %s979_s26 = scalar_lea.vmem (!%p148_p9), %s1280_s17, 4096 }
  0x16   : > { %912 = vmatprep.subr.msk.bf16.mxu0 (!%p148_p9), %vm365_vm0, %v962_v2  ;;  %913 = vmatprep.subr.msk.bf16.mxu1 (!%p148_p9), %vm365_vm0, %v962_v2  ;;  %p980_p11 = scmp.ne.s32.totalorder (!%p148_p9), %s1280_s17, %s979_s26 }
  0x17   : > { %s1424_s28 = smov (!%p177_p10, %s804_s28), 63 }
  0x18   : > { %s805_s4 = sshll.u32 %s1424_s28, 2  ;;  %p981_p12 = pnand %p980_p11, %p1137_p5 }
  0x19   : > { %s1160_s7 = scalar_lea.vmem %s1413_s0, %s805_s4  ;;  %873 = vmatpush3.bf16.msra.mxu0 %v367_v3  ;;  %911 = vmatpush3.bf16.msra.mxu1 %v367_v3  ;;  %s983_s28 = sshll.u32 %s1075_s27, 4  ;;  %s984_s28 = int_to_ptr.vmem [resolvable:$false] %s983_s28 }
  0x1a   : > { %v963_v4 = vld [vmem:[%s1160_s7] sm:$0xff]   ;;  %v964_v5 = vld [vmem:[%s1160_s7 + $0x8] sm:$0xff]   ;;  %v965_v6 = vld [vmem:[%s1160_s7 + $0x10] sm:$0xff]   ;;  %p982_p13 = pneg %p981_p12  ;;  %s985_s29 = scalar_lea.vmem %s984_s28, 8192 }
  0x1b   : > { %874 = vmatprep.mubr.msk.bf16.mxu0 %vm316_vm1, %v963_v4  ;;  %v966_v7 = vld [vmem:[%s1160_s7 + $0x18] sm:$0xff]   ;;  %v971_v8 = vld [vmem:[%s1160_s7 + $0x40] sm:$0xff]   ;;  %v972_v9 = vld [vmem:[%s1160_s7 + $0x48] sm:$0xff]   ;;  %p986_p0 = scmp.lt.s32.totalorder %s1280_s17, %s984_s28  ;;  %p987_p1 = scmp.lt.s32.totalorder %s985_s29, %s979_s26 }
  0x1c   : > { %875 = vmatmul.mubr.msk.bf16.vlgmr.msra.gmra.mrb[0].mxu0 %vm316_vm1, %v964_v5  ;;  %890 = vmatprep.mubr.msk.bf16.mxu1 %vm316_vm1, %v971_v8  ;;  %v973_v10 = vld [vmem:[%s1160_s7 + $0x50] sm:$0xff]   ;;  %v967_v11 = vld [vmem:[%s1160_s7 + $0x20] sm:$0xff]   ;;  %v974_v12 = vld [vmem:[%s1160_s7 + $0x58] sm:$0xff]  }
  0x1d   : > { %878 = vmatprep.mubr.msk.bf16.mxu0 %vm316_vm1, %v965_v6  ;;  %891 = vmatmul.mubr.msk.bf16.vlgmr.msra.gmra.mrb[0].mxu1 %vm316_vm1, %v972_v9  ;;  %v975_v13 = vld [vmem:[%s1160_s7 + $0x60] sm:$0xff]   ;;  %v968_v14 = vld [vmem:[%s1160_s7 + $0x28] sm:$0xff]   ;;  %v969_v15 = vld [vmem:[%s1160_s7 + $0x30] sm:$0xff]   ;;  %p988_p2 = por %p987_p1, %p986_p0 }
  0x1e   : > { %894 = vmatprep.mubr.msk.bf16.mxu1 %vm316_vm1, %v973_v10  ;;  %v976_v16 = vld [vmem:[%s1160_s7 + $0x68] sm:$0xff]   ;;  %v977_v17 = vld [vmem:[%s1160_s7 + $0x70] sm:$0xff]   ;;  %v970_v18 = vld [vmem:[%s1160_s7 + $0x38] sm:$0xff]  }
  0x1f   : > { %v978_v19 = vld [vmem:[%s1160_s7 + $0x78] sm:$0xff]   ;;  %p989_p3 = pnand %p988_p2, %p982_p13 }
  0x24   : > { %879 = vmatmul.mubr.msk.bf16.gmra.mrb[4].mxu0 %vm316_vm1, %v966_v7 }
  0x25   : > { %882 = vmatprep.mubr.msk.bf16.mxu0 %vm316_vm1, %v967_v11  ;;  %895 = vmatmul.mubr.msk.bf16.gmra.mrb[4].mxu1 %vm316_vm1, %v974_v12 }
  0x26   : > { %898 = vmatprep.mubr.msk.bf16.mxu1 %vm316_vm1, %v975_v13 }
  0x2c   : > { %883 = vmatmul.mubr.msk.bf16.gmra.mrb[8].mxu0 %vm316_vm1, %v968_v14 }
  0x2d   : > { %886 = vmatprep.mubr.msk.bf16.mxu0 %vm316_vm1, %v969_v15  ;;  %899 = vmatmul.mubr.msk.bf16.gmra.mrb[8].mxu1 %vm316_vm1, %v976_v16 }
  0x2e   : > { %902 = vmatprep.mubr.msk.bf16.mxu1 %vm316_vm1, %v977_v17 }
  0x34   : > { %887 = vmatmul.mubr.msk.bf16.gmra.mrb[12].mxu0 %vm316_vm1, %v970_v18 }
  0x35   : > { %903 = vmatmul.mubr.msk.bf16.gmra.mrb[12].mxu1 %vm316_vm1, %v978_v19 }
  0xef   : > { %v876_v20 = vpop.f32.mrb[0].mxu0 }
  0xf0   : > { %532 = vst [vmem:[%s1201_s10 + $0x10] sm:$0xff] %v876_v20  ;;  %v403_v21 = vpop.f32.mrb[1].mxu0  ;;  %v1207_v27 = vpop.f32.mrb[0].mxu1  ;;  %v601_v28 = vmul.f32 %v876_v20, %v876_v20 }
  0xf1   : > { %530 = vst [vmem:[%s1201_s10] sm:$0xff] %v403_v21  ;;  %v877_v22 = vpop.f32.mrb[2].mxu0  ;;  %v599_v24 = vmul.f32 %v403_v21, %v403_v21  ;;  %548 = vst [vmem:[%s1201_s10 + $0x90] sm:$0xff] %v1207_v27  ;;  %v1211_v31 = vpop.f32.mrb[1].mxu1 }
  0xf2   : > { %533 = vst [vmem:[%s1201_s10 + $0x18] sm:$0xff] %v877_v22  ;;  %v406_v23 = vpop.f32.mrb[3].mxu0  ;;  %546 = vst [vmem:[%s1201_s10 + $0x80] sm:$0xff] %v1211_v31  ;;  %v1215_v32 = vpop.f32.mrb[2].mxu1  ;;  %v602_v33 = vmul.f32 %v877_v22, %v877_v22 }
  0xf3   : > { %531 = vst [vmem:[%s1201_s10 + $0x8] sm:$0xff] %v406_v23  ;;  %v562_v25 = vadd.f32 %v406_v23, %v403_v21  ;;  %v600_v26 = vmul.f32 %v406_v23, %v406_v23  ;;  %549 = vst [vmem:[%s1201_s10 + $0x98] sm:$0xff] %v1215_v32  ;;  %v1219_v37 = vpop.f32.mrb[3].mxu1 }
  0xf4   : > { %547 = vst [vmem:[%s1201_s10 + $0x88] sm:$0xff] %v1219_v37 }
  0xf5   : > { %v563_v29 = vadd.f32 %v876_v20, %v562_v25  ;;  %v631_v30 = vadd.f32 %v600_v26, %v599_v24 }
  0xf7   : > { %v632_v34 = vadd.f32 %v631_v30, %v601_v28  ;;  %v880_v35 = vpop.f32.mrb[4].mxu0  ;;  %v564_v36 = vadd.f32 %v877_v22, %v563_v29 }
  0xf8   : > { %536 = vst [vmem:[%s1201_s10 + $0x30] sm:$0xff] %v880_v35  ;;  %v419_v38 = vpop.f32.mrb[5].mxu0  ;;  %v1227_v47 = vpop.f32.mrb[4].mxu1  ;;  %v605_v48 = vmul.f32 %v880_v35, %v880_v35 }
  0xf9   : > { %534 = vst [vmem:[%s1201_s10 + $0x20] sm:$0xff] %v419_v38  ;;  %v565_v39 = vadd.f32 %v564_v36, %v419_v38  ;;  %v603_v40 = vmul.f32 %v419_v38, %v419_v38  ;;  %v633_v41 = vadd.f32 %v632_v34, %v602_v33  ;;  %v881_v42 = vpop.f32.mrb[6].mxu0  ;;  %552 = vst [vmem:[%s1201_s10 + $0xb0] sm:$0xff] %v1227_v47  ;;  %v1231_v51 = vpop.f32.mrb[5].mxu1 }
  0xfa   : > { %537 = vst [vmem:[%s1201_s10 + $0x38] sm:$0xff] %v881_v42  ;;  %v422_v43 = vpop.f32.mrb[7].mxu0  ;;  %550 = vst [vmem:[%s1201_s10 + $0xa0] sm:$0xff] %v1231_v51  ;;  %v1235_v52 = vpop.f32.mrb[6].mxu1  ;;  %v606_v53 = vmul.f32 %v881_v42, %v881_v42 }
  0xfb   : > { %v634_v44 = vadd.f32 %v633_v41, %v603_v40  ;;  %535 = vst [vmem:[%s1201_s10 + $0x28] sm:$0xff] %v422_v43  ;;  %v566_v45 = vadd.f32 %v565_v39, %v422_v43  ;;  %v604_v46 = vmul.f32 %v422_v43, %v422_v43  ;;  %553 = vst [vmem:[%s1201_s10 + $0xb8] sm:$0xff] %v1235_v52  ;;  %v1239_v57 = vpop.f32.mrb[7].mxu1 }
  0xfc   : > { %551 = vst [vmem:[%s1201_s10 + $0xa8] sm:$0xff] %v1239_v57 }
  0xfd   : > { %v567_v49 = vadd.f32 %v880_v35, %v566_v45  ;;  %v635_v50 = vadd.f32 %v634_v44, %v604_v46  ;;  %v615_v35 = vmul.f32 %v1211_v31, %v1211_v31 }
  0xff   : > { %v636_v54 = vadd.f32 %v635_v50, %v605_v48  ;;  %v884_v55 = vpop.f32.mrb[8].mxu0  ;;  %v568_v56 = vadd.f32 %v881_v42, %v567_v49 }
 0x100   : > { %540 = vst [vmem:[%s1201_s10 + $0x50] sm:$0xff] %v884_v55  ;;  %v435_v58 = vpop.f32.mrb[9].mxu0  ;;  %v1247_v3 = vpop.f32.mrb[8].mxu1  ;;  %v609_v4 = vmul.f32 %v884_v55, %v884_v55 }
 0x101   : > { %538 = vst [vmem:[%s1201_s10 + $0x40] sm:$0xff] %v435_v58  ;;  %v569_v59 = vadd.f32 %v568_v56, %v435_v58  ;;  %v607_v60 = vmul.f32 %v435_v58, %v435_v58  ;;  %v637_v61 = vadd.f32 %v636_v54, %v606_v53  ;;  %v885_v62 = vpop.f32.mrb[10].mxu0  ;;  %556 = vst [vmem:[%s1201_s10 + $0xd0] sm:$0xff] %v1247_v3  ;;  %v1251_v7 = vpop.f32.mrb[9].mxu1 }
 0x102   : > { %541 = vst [vmem:[%s1201_s10 + $0x58] sm:$0xff] %v885_v62  ;;  %v438_v63 = vpop.f32.mrb[11].mxu0  ;;  %554 = vst [vmem:[%s1201_s10 + $0xc0] sm:$0xff] %v1251_v7  ;;  %v1255_v8 = vpop.f32.mrb[10].mxu1  ;;  %v610_v9 = vmul.f32 %v885_v62, %v885_v62 }
 0x103   : > { %v638_v0 = vadd.f32 %v637_v61, %v607_v60  ;;  %539 = vst [vmem:[%s1201_s10 + $0x48] sm:$0xff] %v438_v63  ;;  %v570_v1 = vadd.f32 %v569_v59, %v438_v63  ;;  %v608_v2 = vmul.f32 %v438_v63, %v438_v63  ;;  %557 = vst [vmem:[%s1201_s10 + $0xd8] sm:$0xff] %v1255_v8  ;;  %v1259_v13 = vpop.f32.mrb[11].mxu1 }
 0x104   : > { %555 = vst [vmem:[%s1201_s10 + $0xc8] sm:$0xff] %v1259_v13 }
 0x105   : > { %v571_v5 = vadd.f32 %v884_v55, %v570_v1  ;;  %v639_v6 = vadd.f32 %v638_v0, %v608_v2 }
 0x107   : > { %v640_v10 = vadd.f32 %v639_v6, %v609_v4  ;;  %v888_v11 = vpop.f32.mrb[12].mxu0  ;;  %v572_v12 = vadd.f32 %v885_v62, %v571_v5 }
 0x108   : > { %544 = vst [vmem:[%s1201_s10 + $0x70] sm:$0xff] %v888_v11  ;;  %v451_v14 = vpop.f32.mrb[13].mxu0  ;;  %v1269_v23 = vpop.f32.mrb[12].mxu1  ;;  %v613_v24 = vmul.f32 %v888_v11, %v888_v11 }
 0x109   : > { %542 = vst [vmem:[%s1201_s10 + $0x60] sm:$0xff] %v451_v14  ;;  %v573_v15 = vadd.f32 %v572_v12, %v451_v14  ;;  %v611_v16 = vmul.f32 %v451_v14, %v451_v14  ;;  %v641_v17 = vadd.f32 %v640_v10, %v610_v9  ;;  %v889_v18 = vpop.f32.mrb[14].mxu0  ;;  %560 = vst [vmem:[%s1201_s10 + $0xf0] sm:$0xff] %v1269_v23  ;;  %v1273_v28 = vpop.f32.mrb[13].mxu1 }
 0x10a   : > { %545 = vst [vmem:[%s1201_s10 + $0x78] sm:$0xff] %v889_v18  ;;  %v454_v19 = vpop.f32.mrb[15].mxu0  ;;  %558 = vst [vmem:[%s1201_s10 + $0xe0] sm:$0xff] %v1273_v28  ;;  %v1284_v29 = vpop.f32.mrb[14].mxu1  ;;  %v614_v30 = vmul.f32 %v889_v18, %v889_v18 }
 0x10b   : > { %v642_v20 = vadd.f32 %v641_v17, %v611_v16  ;;  %543 = vst [vmem:[%s1201_s10 + $0x68] sm:$0xff] %v454_v19  ;;  %v574_v21 = vadd.f32 %v573_v15, %v454_v19  ;;  %v612_v22 = vmul.f32 %v454_v19, %v454_v19  ;;  %561 = vst [vmem:[%s1201_s10 + $0xf8] sm:$0xff] %v1284_v29  ;;  %v1290_v36 = vpop.f32.mrb[15].mxu1 }
 0x10c   : > { %559 = vst [vmem:[%s1201_s10 + $0xe8] sm:$0xff] %v1290_v36 }
 0x10d   : > { %v575_v25 = vadd.f32 %v888_v11, %v574_v21  ;;  %v643_v26 = vadd.f32 %v642_v20, %v612_v22 }
 0x10f   : > { %v644_v33 = vadd.f32 %v643_v26, %v613_v24  ;;  %v576_v34 = vadd.f32 %v889_v18, %v575_v25 }
 0x111   : > { %v577_v38 = vadd.f32 %v576_v34, %v1211_v31  ;;  %v645_v39 = vadd.f32 %v644_v33, %v614_v30 }
 0x112   : > { %992 = shalt.err (!%p989_p3)
}
 0x113   : > { %s993_s30 = scalar_lea.hbm %s1278_s24, 4096  ;;  %s997_s6 = scalar_lea.hbm %s1415_s2, 8192 }
 0x114   : > { %p994_p4 = scmp.ne.s32.totalorder %s1278_s24, %s993_s30  ;;  %p998_p9 = scmp.lt.u32.totalorder %s1278_s24, %s1415_s2 }
 0x115   : > { %p999_p10 = scmp.lt.u32.totalorder %s997_s6, %s993_s30  ;;  %p1001_p12 = scmp.lt.u32.totalorder %s993_s30, %s1278_s24 }
 0x116   : > { %p995_p7 = pnand %p994_p4, %p1137_p5 }
 0x117   : > { %p1000_p11 = por %p999_p10, %p998_p9 }
 0x118   : > { %p996_p8 = pneg %p995_p7 }
 0x119   : > { %p1002_p13 = por %p1001_p12, %p1000_p11 }
 0x11b   : > { %p1003_p0 = pnand %p1002_p13, %p996_p8 }
 0x11d   : > { %1006 = shalt.err (!%p1003_p0)
}
 0x11e   : > { %s1076_s10 = smov 128   ;;  %s1077_s11 = smov 8   ;;  %v646_v31 = vadd.f32 %v645_v39, %v615_v35  ;;  %v578_v40 = vadd.f32 %v577_v38, %v1219_v37  ;;  %v616_v41 = vmul.f32 %v1219_v37, %v1219_v37  ;;  %v617_v42 = vmul.f32 %v1207_v27, %v1207_v27 }
 0x11f   : > { %914 = dma.vmem_to_hbm [thread:$0]  (%p1137_p5), %s1280_s17, 4096, %s1278_s24, %s673_s25, %s1076_s10, %s1076_s10, %s1077_s11   ;;  %v618_v45 = vmul.f32 %v1215_v32, %v1215_v32  ;;  %v619_v49 = vmul.f32 %v1231_v51, %v1231_v51  ;;  %v620_v55 = vmul.f32 %v1239_v57, %v1239_v57  ;;  %v624_v0 = vmul.f32 %v1259_v13, %v1259_v13 }
 0x120   : > { %v579_v43 = vadd.f32 %v1207_v27, %v578_v40  ;;  %v647_v44 = vadd.f32 %v646_v31, %v616_v41  ;;  %v621_v27 = vmul.f32 %v1227_v47, %v1227_v47  ;;  %v627_v6 = vmul.f32 %v1273_v28, %v1273_v28  ;;  %s803_s17 = sshll.u32 %s1198_s8, 3  ;;  %s845_s19 = sshll.u32 %s1120_s16, 7 }
 0x121   : > { %v629_v12 = vmul.f32 %v1269_v23, %v1269_v23  ;;  %vm668_vm2 = vcmask 1040384   ;;  %s175_s20 = scalar_lea.vmem [#allocation4], %s803_s17  ;;  %s1369_s27 = scalar_lea.hbm %s1416_s3, %s845_s19 }
 0x122   : > { %v648_v46 = vadd.f32 %v647_v44, %v617_v42  ;;  %v580_v48 = vadd.f32 %v1215_v32, %v579_v43  ;;  %v622_v32 = vmul.f32 %v1235_v52, %v1235_v52  ;;  %s707_s24 = sshll.u32 %s175_s20, 4  ;;  %s678_s28 = scalar_lea.sflag [#allocation5], %s1198_s8  ;;  %s1371_s24 = int_to_ptr.vmem [resolvable:$true] %s707_s24 }
 0x123   : > { %s1007_s16 = scalar_lea.vmem %s1371_s24, 128  ;;  %s1078_s29 = smov [#allocation4]  }
 0x124   : > { %v581_v50 = vadd.f32 %v580_v48, %v1231_v51  ;;  %v649_v53 = vadd.f32 %v648_v46, %v618_v45  ;;  %v623_v51 = vmul.f32 %v1251_v7, %v1251_v7  ;;  %p1008_p1 = scmp.ne.s32.totalorder %s1371_s24, %s1007_s16  ;;  %s1011_s30 = sshll.u32 %s1078_s29, 4  ;;  %s1012_s30 = int_to_ptr.vmem [resolvable:$false] %s1011_s30 }
 0x125   : > { %s1013_s4 = scalar_lea.vmem %s1012_s30, 256  ;;  %p1014_p4 = scmp.lt.s32.totalorder %s1371_s24, %s1012_s30 }
 0x126   : > { %v650_v54 = vadd.f32 %v649_v53, %v619_v49  ;;  %v582_v37 = vadd.f32 %v581_v50, %v1239_v57  ;;  %p1009_p2 = pnand %p1008_p1, %p1137_p5  ;;  %p1015_p7 = scmp.lt.s32.totalorder %s1013_s4, %s1007_s16 }
 0x128   : > { %v583_v56 = vadd.f32 %v1227_v47, %v582_v37  ;;  %v651_v58 = vadd.f32 %v650_v54, %v620_v55  ;;  %v625_v47 = vmul.f32 %v1247_v3, %v1247_v3  ;;  %p1010_p3 = pneg %p1009_p2  ;;  %p1016_p8 = por %p1015_p7, %p1014_p4 }
 0x12a   : > { %v652_v59 = vadd.f32 %v651_v58, %v621_v27  ;;  %v584_v60 = vadd.f32 %v1235_v52, %v583_v56  ;;  %v626_v52 = vmul.f32 %v1255_v8, %v1255_v8  ;;  %p1017_p9 = pnand %p1016_p8, %p1010_p3 }
 0x12c   : > { %v585_v61 = vadd.f32 %v584_v60, %v1251_v7  ;;  %v653_v62 = vadd.f32 %v652_v59, %v622_v32 }
 0x12e   : > { %v654_v63 = vadd.f32 %v653_v62, %v623_v51  ;;  %v586_v57 = vadd.f32 %v585_v61, %v1259_v13 }
 0x130   : > { %v587_v1 = vadd.f32 %v1247_v3, %v586_v57  ;;  %v655_v2 = vadd.f32 %v654_v63, %v624_v0  ;;  %v628_v3 = vmul.f32 %v1290_v36, %v1290_v36 }
 0x132   : > { %v656_v4 = vadd.f32 %v655_v2, %v625_v47  ;;  %v588_v5 = vadd.f32 %v1255_v8, %v587_v1  ;;  %v630_v8 = vmul.f32 %v1284_v29, %v1284_v29 }
 0x134   : > { %v589_v7 = vadd.f32 %v588_v5, %v1273_v28  ;;  %v657_v9 = vadd.f32 %v656_v4, %v626_v52 }
 0x136   : > { %v658_v10 = vadd.f32 %v657_v9, %v627_v6  ;;  %v590_v11 = vadd.f32 %v589_v7, %v1290_v36 }
 0x138   : > { %v591_v13 = vadd.f32 %v1269_v23, %v590_v11  ;;  %v659_v14 = vadd.f32 %v658_v10, %v628_v3 }
 0x13a   : > { %v592_v15 = vadd.f32 %v1284_v29, %v591_v13  ;;  %v660_v16 = vadd.f32 %v659_v14, %v629_v12 }
 0x13c   : > { %v593_v17 = vrot.slane %v592_v15, 4  ;;  %v661_v18 = vadd.f32 %v660_v16, %v630_v8 }
 0x13e   : > { %v594_v19 = vadd.f32 %v593_v17, %v592_v15  ;;  %v662_v20 = vrot.slane %v661_v18, 4 }
 0x140   : > { %v595_v21 = vrot.slane %v594_v19, 2  ;;  %v663_v22 = vadd.f32 %v662_v20, %v661_v18 }
 0x142   : > { %v596_v24 = vadd.f32 %v595_v21, %v594_v19  ;;  %v664_v25 = vrot.slane %v663_v22, 2 }
 0x144   : > { %v597_v26 = vrot.slane %v596_v24, 1  ;;  %v665_v23 = vadd.f32 %v664_v25, %v663_v22 }
 0x146   : > { %v666_v28 = vrot.slane %v665_v23, 1  ;;  %v598_v29 = vadd.f32 %v597_v26, %v596_v24 }
 0x148   : > { %v667_v30 = vadd.f32 %v666_v28, %v665_v23 }
 0x14a   : > { %v669_v33 = vsel %vm668_vm2, %v598_v29, %v667_v30 }
 0x14b   : > { %v670_v34 = vsel %vm365_vm0, %v669_v33, 0.0 }
 0x14c   : > { %671 = vst [vmem:[%s175_s20] sm:$0xff] %v670_v34 }
 0x14d   : > { %1020 = shalt.err (!%p1017_p9)
}
 0x14e   : > { %s1021_s8 = scalar_lea.hbm %s1369_s27, 128  ;;  %s1025_s7 = scalar_lea.hbm %s1416_s3, 256 }
 0x14f   : > { %p1022_p10 = scmp.ne.s32.totalorder %s1369_s27, %s1021_s8  ;;  %p1026_p13 = scmp.lt.u32.totalorder %s1369_s27, %s1416_s3 }
 0x150   : > { %p1027_p0 = scmp.lt.u32.totalorder %s1025_s7, %s1021_s8  ;;  %p1029_p2 = scmp.lt.u32.totalorder %s1021_s8, %s1369_s27 }
 0x151   : > { %p1023_p11 = pnand %p1022_p10, %p1137_p5 }
 0x152   : > { %p1028_p1 = por %p1027_p0, %p1026_p13 }
 0x153   : > { %p1024_p12 = pneg %p1023_p11 }
 0x154   : > { %p1030_p3 = por %p1029_p2, %p1028_p1 }
 0x156   : > { %p1031_p4 = pnand %p1030_p3, %p1024_p12 }
 0x158   : > { %1034 = shalt.err (!%p1031_p4)
}
 0x159   : > { %915 = dma.vmem_to_hbm [thread:$0]  (%p1137_p5), %s1371_s24, 128, %s1369_s27, %s678_s28  }
 0x15a PF: > { %p925_p7 = scmp.ge.s32.totalorder %s1073_s15, 2  ;;  %s719_s11 = sand.u32 1, %s1061_s12  }
 0x15b   : > { %s720_s17 = scalar_lea.sflag [#allocation3], %s719_s11 }
 0x15c   : > { %p919_p8 = pnand %p925_p7, %p1141_p6 }
 0x15e   : > { %1052 = dma.done.wait (!%p919_p8), %s720_s17, 4096  }
 0x15f   : > { %1054 = vsyncadd (!%p919_p8), %s720_s17, 4294963200  ;;  %s729_s19 = scalar_lea.sflag [#allocation5], %s719_s11 }
 0x160   : > { %1056 = dma.done.wait (!%p919_p8), %s729_s19, 128  }
 0x161   : > { %1058 = vsyncadd (!%p919_p8), %s729_s19, 4294967168  ;;  %p17_p5 = scmp.ge.s32.totalorder %s1124_s18, 4   ;;  %s1419_s12 = smov %s1065_s13 }
 0x162   : > { %s1420_s13 = smov %s1069_s14  ;;  %s1421_s14 = smov %s1135_s21 }
 0x163   : > { %s1422_s15 = smov %s1124_s18  ;;  %19 = sbr.rel (!%p17_p5) target bundleno = 5 (0x5), region = 80 }
 0x16a   :  { %734 = vsyncpa [#allocation3], 1 }
 0x16b   :  { %736 = vsyncpa [#allocation3 + $0x1], 1 }
 0x16c   :  { %737 = vsyncpa [#allocation5], 1 }
 0x16d   :  { %739 = vsyncpa [#allocation5 + $0x1], 1 }

</bundles_post_ra>
